<compile_context>
chip_gen: v7x
topology: tpu7x:2x2x1
jax: 0.10.0
libtpu: 0.0.40
codegen_flags: <defaults>
</compile_context>

<pallas_src>
import functools

import jax
import jax.numpy as jnp
from jax import lax
from jax.experimental import pallas as pl
from jax.experimental.pallas import tpu as pltpu


def _protocount_kernel(proto_ref, x_ref, out_ref,
                       p2_ref, acc_ref, piota_ref, liota_ref,
                       *, n_rows, tile_n, tiles_per_split, transposed_x):
    c = pl.program_id(0)          # split index (sharded across TCs when >1)
    j = pl.program_id(1)          # tile index within split (reduction axis)
    n_j = pl.num_programs(1)
    P = proto_ref.shape[0]

    @pl.when(j == 0)
    def _init():
        # Hoist per-split constants: 0.5*||p||^2 column and both iota planes.
        # (broadcast_in_dim is not CSE'd by JAX -> compute once, not every step.)
        proto = proto_ref[...].astype(jnp.float32)
        p2_ref[...] = 0.5 * jnp.sum(proto * proto, axis=1, keepdims=True)
        acc_ref[...] = jnp.zeros_like(acc_ref)
        piota_ref[...] = lax.broadcasted_iota(jnp.int32, piota_ref.shape, 0)
        liota_ref[...] = lax.broadcasted_iota(jnp.int32, liota_ref.shape, 1)

    # (P, tile_n) scores on the MXU; contract D on both operands so the patch axis
    # stays on lanes and all downstream vector work is full-lane.
    if transposed_x:                                   # x tile is (D, tile_n)
        dnums = (((1,), (0,)), ((), ()))
    else:                                              # x tile is (tile_n, D)
        dnums = (((1,), (1,)), ((), ()))
    score = lax.dot_general(proto_ref[...], x_ref[...], dimension_numbers=dnums,
                            preferred_element_type=jnp.float32)      # (P, tile_n)

    # argmin_p ||p - x||^2 == argmax_p (p.x - 0.5*||p||^2); the per-patch ||x||^2
    # term is constant over p and dropped entirely.
    adj = score - p2_ref[...]                                          # (P, tile_n)

    # First-occurrence winner over the (sublane) prototype axis (matches torch argmin).
    iota_p = piota_ref[...]                                            # (P, tile_n)
    best = jnp.max(adj, axis=0, keepdims=True)                         # (1, tile_n)
    idx = jnp.min(jnp.where(adj >= best, iota_p, P),
                  axis=0, keepdims=True)                               # (1, tile_n)

    # Mask lanes past the true number of patches (remainder tiles and clamped
    # out-of-range tiles contribute nothing).
    row0 = (c * tiles_per_split + j) * tile_n
    valid = liota_ref[...] < (n_rows - row0)                           # (1, tile_n)

    onehot = jnp.where(jnp.logical_and(iota_p == idx, valid), 1.0, 0.0)  # (P, tile_n)
    # Histogram: lane-reduce to (P, 1) and accumulate in VMEM scratch.
    acc_ref[...] += jnp.sum(onehot, axis=1, keepdims=True)             # (P, 1)

    @pl.when(j == n_j - 1)
    def _finalize():
        # Single HBM writeback per split.
        out_ref[...] = acc_ref[...].reshape(out_ref.shape)             # (1, P, 1)


def protocount_forward(prototypes, x, *, tile_n=8192, num_splits=1,
                       transposed_x=False, x_buffers=None):
    """ProtoCount forward.

    prototypes: (P, D); x: (N, D) (or (D, N) if transposed_x=True).
    Any float dtype (bf16 halves HBM traffic); returns (1, P) float32.
    num_splits: 1 on single-TC chips (v5e/v6e), 2 on v7x to use both TensorCores.
    """
    P, D = prototypes.shape
    if transposed_x:
        D2, N = x.shape
    else:
        N, D2 = x.shape
    assert D == D2, "feature dims must match"

    # Prototypes are tiny; match x's dtype so the MXU sees a single operand dtype.
    prototypes = prototypes.astype(x.dtype)

    # Tile sizing: lane-aligned, clamped for small bags, and kept under a ~24 MiB
    # double-buffered x stream so large sweeps never OOM v7x's 64 MiB VMEM.
    itemsize = int(jnp.dtype(x.dtype).itemsize)
    vmem_row_cap = (24 * 1024 * 1024) // (2 * 128 * itemsize)
    tile_n = max(128, min(int(tile_n), int(vmem_row_cap)))
    tile_n = min(tile_n, ((N + 127) // 128) * 128)
    n_tiles = pl.cdiv(N, tile_n)
    num_splits = max(1, min(num_splits, n_tiles))
    tiles_per_split = pl.cdiv(n_tiles, num_splits)
    last_tile = n_tiles - 1

    kernel = functools.partial(
        _protocount_kernel,
        n_rows=N, tile_n=tile_n, tiles_per_split=tiles_per_split,
        transposed_x=transposed_x)

    def tile_index(c, j):
        # Tiles whose logical index runs past the array are clamped onto the last
        # real tile; their rows are zeroed by the in-kernel validity mask.
        return jnp.minimum(c * tiles_per_split + j, last_tile)

    if transposed_x:
        x_block = (D, tile_n)
        x_index_map = lambda c, j: (0, tile_index(c, j))
    else:
        x_block = (tile_n, D)
        x_index_map = lambda c, j: (tile_index(c, j), 0)

    x_spec_kwargs = {}
    if x_buffers is not None:
        # Deeper pipeline for small-tile / latency paths; sweep 2 vs 3.
        x_spec_kwargs["pipeline_mode"] = pl.Buffered(x_buffers)
    x_spec = pl.BlockSpec(x_block, x_index_map, **x_spec_kwargs)

    partial_counts = pl.pallas_call(
        kernel,
        out_shape=jax.ShapeDtypeStruct((num_splits, P, 1), jnp.float32),
        grid_spec=pltpu.PrefetchScalarGridSpec(
            num_scalar_prefetch=0,
            grid=(num_splits, tiles_per_split),
            in_specs=[
                pl.BlockSpec((P, D), lambda c, j: (0, 0)),   # prototypes, resident
                x_spec,                                      # patch tile
            ],
            out_specs=pl.BlockSpec((1, P, 1), lambda c, j: (c, 0, 0)),
            scratch_shapes=[
                pltpu.VMEM((P, 1), jnp.float32),        # hoisted 0.5*||p||^2
                pltpu.VMEM((P, 1), jnp.float32),        # per-split count accumulator
                pltpu.VMEM((P, tile_n), jnp.int32),     # hoisted prototype iota
                pltpu.VMEM((1, tile_n), jnp.int32),     # hoisted lane iota
            ],
        ),
        compiler_params=pltpu.CompilerParams(
            dimension_semantics=("parallel", "arbitrary")),
    )(prototypes, x)

    # Combine per-split partial counts and L2-normalize (matches the torch module,
    # including the NaN for an all-zero count vector / empty bag).
    counts = jnp.sum(partial_counts[:, :, 0], axis=0, keepdims=True)   # (1, P)
    return counts / jnp.linalg.norm(counts, axis=1, keepdims=True)


def protocount_reference(prototypes, x):
    # Pure-JAX reference mirroring the torch module.
    diff = prototypes[:, None, :].astype(jnp.float32) - x[None, :, :].astype(jnp.float32)
    dist = jnp.sqrt(jnp.sum(diff * diff, axis=-1))         # (P, N)
    ident = jnp.argmin(dist, axis=0)                       # (N,)
    P = prototypes.shape[0]
    counts = jnp.sum(
        (ident[:, None] == jnp.arange(P)[None, :]).astype(jnp.float32),
        axis=0)[None, :]                                   # (1, P)
    return counts / jnp.linalg.norm(counts, axis=1, keepdims=True)


if __name__ == "__main__":
    # Small shapes consistent with the module: out_size = n_proto = 16,
    # in_dim = emb_dim = 64, bag of N patch features.
    P, D = 16, 64
    key = jax.random.PRNGKey(0)

    # Case 1: default big-tile single-step path (tile clamps down to the bag size).
    # Case 2: small tile + remainder masking + 2-way split (v7x-style) path.
    for N, kwargs in [(256, dict()),
                      (333, dict(tile_n=128, num_splits=2))]:
        kp, kx, key = jax.random.split(key, 3)
        prototypes = jax.random.normal(kp, (P, D), dtype=jnp.float32)
        x = jax.random.normal(kx, (N, D), dtype=jnp.float32)

        out = jax.block_until_ready(protocount_forward(prototypes, x, **kwargs))
        ref = protocount_reference(prototypes, x)
        assert out.shape == (1, P)
        assert jnp.allclose(out, ref, atol=1e-5, rtol=1e-5), (N, out, ref)

    # Case 3: lane-dense (D, N) input layout (no D=64 lane padding on the x stream).
    kp, kx, key = jax.random.split(key, 3)
    prototypes = jax.random.normal(kp, (P, D), dtype=jnp.float32)
    x = jax.random.normal(kx, (512, D), dtype=jnp.float32)
    out_t = jax.block_until_ready(
        protocount_forward(prototypes, x.T, transposed_x=True))
    ref_t = protocount_reference(prototypes, x)
    assert out_t.shape == (1, P)
    assert jnp.allclose(out_t, ref_t, atol=1e-5, rtol=1e-5)

    # Case 4: bf16 inputs (halved HBM traffic). Near-tied prototypes may round
    # differently than the f32 reference, so use a loose tolerance + unit-norm check.
    kp, kx, key = jax.random.split(key, 3)
    prototypes = jax.random.normal(kp, (P, D), dtype=jnp.float32)
    x = jax.random.normal(kx, (300, D), dtype=jnp.float32)
    out_bf = jax.block_until_ready(
        protocount_forward(prototypes.astype(jnp.bfloat16), x.astype(jnp.bfloat16)))
    ref_bf = protocount_reference(prototypes.astype(jnp.bfloat16).astype(jnp.float32),
                                  x.astype(jnp.bfloat16).astype(jnp.float32))
    assert out_bf.shape == (1, P)
    assert jnp.allclose(jnp.linalg.norm(out_bf, axis=1), 1.0, atol=1e-4)
    assert jnp.allclose(out_bf, ref_bf, atol=5e-2)

    print("KERNEL_OK")
</pallas_src>

<mosaic_0001>
module attributes {stable_mosaic.version = 11 : i64} {
  func.func @_protocount_kernel(%arg0: i32, %arg1: i32, %arg2: memref<16x64xf32, #tpu.memory_space<vmem>>, %arg3: memref<256x64xf32, #tpu.memory_space<vmem>>, %arg4: memref<1x16x1xf32, #tpu.memory_space<vmem>>, %arg5: memref<16x1xf32, #tpu.memory_space<vmem>>, %arg6: memref<16x1xf32, #tpu.memory_space<vmem>>, %arg7: memref<16x256xi32, #tpu.memory_space<vmem>>, %arg8: memref<1x256xi32, #tpu.memory_space<vmem>>) attributes {dimension_semantics = [#tpu.dimension_semantics<parallel>, #tpu.dimension_semantics<arbitrary>], iteration_bounds = array<i64: 1, 1>, scalar_prefetch = 0 : i64, scratch_operands = 4 : i64, tpu.core_type = #tpu.core_type<tc>, window_params = [{pipeline_mode = #tpu.pipeline_mode<synchronous>, transform_indices = @transform_0, window_bounds = array<i64: 16, 64>}, {transform_indices = @transform_1, window_bounds = array<i64: 256, 64>}, {transform_indices = @transform_2, window_bounds = array<i64: 1, 16, 1>}]} {
    %c0_i32 = arith.constant 0 : i32
    %0 = arith.cmpi eq, %arg1, %c0_i32 : i32
    %1 = arith.extui %0 : i1 to i32
    %c0_i32_0 = arith.constant 0 : i32
    %2 = arith.cmpi ne, %1, %c0_i32_0 : i32
    scf.if %2 {
      %c0_22 = arith.constant 0 : index
      %c0_23 = arith.constant 0 : index
      %40 = vector.load %arg2[%c0_22, %c0_23] : memref<16x64xf32, #tpu.memory_space<vmem>>, vector<16x64xf32>
      %41 = arith.mulf %40, %40 : vector<16x64xf32>
      %cst_24 = arith.constant dense<0.000000e+00> : vector<16xf32>
      %42 = vector.multi_reduction <add>, %41, %cst_24 [1] : vector<16x64xf32> to vector<16xf32>
      %43 = vector.shape_cast %42 : vector<16xf32> to vector<16x1xf32>
      %cst_25 = arith.constant 5.000000e-01 : f32
      %44 = vector.broadcast %cst_25 : f32 to vector<16x1xf32>
      %45 = arith.mulf %44, %43 : vector<16x1xf32>
      %c0_26 = arith.constant 0 : index
      %c0_27 = arith.constant 0 : index
      %46 = vector.load %arg5[%c0_26, %c0_27] : memref<16x1xf32, #tpu.memory_space<vmem>>, vector<16x1xf32>
      tpu.vector_store %arg5[%c0_26, %c0_27], %45 {strides = array<i32>} : memref<16x1xf32, #tpu.memory_space<vmem>>, vector<16x1xf32>,
      %cst_28 = arith.constant 0.000000e+00 : f32
      %47 = vector.broadcast %cst_28 : f32 to vector<16x1xf32>
      %c0_29 = arith.constant 0 : index
      %c0_30 = arith.constant 0 : index
      %48 = vector.load %arg6[%c0_29, %c0_30] : memref<16x1xf32, #tpu.memory_space<vmem>>, vector<16x1xf32>
      tpu.vector_store %arg6[%c0_29, %c0_30], %47 {strides = array<i32>} : memref<16x1xf32, #tpu.memory_space<vmem>>, vector<16x1xf32>,
      %49 = tpu.iota {dimensions = array<i32: 0>} : vector<16x256xi32>
      %c0_31 = arith.constant 0 : index
      %c0_32 = arith.constant 0 : index
      %50 = vector.load %arg7[%c0_31, %c0_32] : memref<16x256xi32, #tpu.memory_space<vmem>>, vector<16x256xi32>
      tpu.vector_store %arg7[%c0_31, %c0_32], %49 {strides = array<i32>} : memref<16x256xi32, #tpu.memory_space<vmem>>, vector<16x256xi32>,
      %51 = tpu.iota {dimensions = array<i32: 1>} : vector<1x256xi32>
      %c0_33 = arith.constant 0 : index
      %c0_34 = arith.constant 0 : index
      %52 = vector.load %arg8[%c0_33, %c0_34] : memref<1x256xi32, #tpu.memory_space<vmem>>, vector<1x256xi32>
      tpu.vector_store %arg8[%c0_33, %c0_34], %51 {strides = array<i32>} : memref<1x256xi32, #tpu.memory_space<vmem>>, vector<1x256xi32>,
    } else {
    }
    %c0 = arith.constant 0 : index
    %c0_1 = arith.constant 0 : index
    %3 = vector.load %arg2[%c0, %c0_1] : memref<16x64xf32, #tpu.memory_space<vmem>>, vector<16x64xf32>
    %c0_2 = arith.constant 0 : index
    %c0_3 = arith.constant 0 : index
    %4 = vector.load %arg3[%c0_2, %c0_3] : memref<256x64xf32, #tpu.memory_space<vmem>>, vector<256x64xf32>
    %cst = arith.constant dense<0.000000e+00> : vector<16x256xf32>
    %5 = tpu.matmul %3, %4, %cst {dimension_numbers = #tpu.dot_dimension_numbers<[1], [1], [0], [0], [0, 0, 1, 0], [], []>} : vector<16x64xf32>, vector<256x64xf32>, vector<16x256xf32> -> vector<16x256xf32>
    %c0_4 = arith.constant 0 : index
    %c0_5 = arith.constant 0 : index
    %6 = vector.load %arg5[%c0_4, %c0_5] : memref<16x1xf32, #tpu.memory_space<vmem>>, vector<16x1xf32>
    %7 = vector.broadcast %6 : vector<16x1xf32> to vector<16x256xf32>
    %8 = arith.subf %5, %7 : vector<16x256xf32>
    %c0_6 = arith.constant 0 : index
    %c0_7 = arith.constant 0 : index
    %9 = vector.load %arg7[%c0_6, %c0_7] : memref<16x256xi32, #tpu.memory_space<vmem>>, vector<16x256xi32>
    %cst_8 = arith.constant dense<0xFF800000> : vector<256xf32>
    %10 = vector.multi_reduction <maximumf>, %8, %cst_8 [0] : vector<16x256xf32> to vector<256xf32>
    %11 = vector.shape_cast %10 : vector<256xf32> to vector<1x256xf32>
    %12 = vector.broadcast %11 : vector<1x256xf32> to vector<16x256xf32>
    %13 = arith.cmpf oge, %8, %12 : vector<16x256xf32>
    %c16_i32 = arith.constant 16 : i32
    %14 = vector.broadcast %c16_i32 : i32 to vector<16x256xi32>
    %15 = arith.select %13, %9, %14 : vector<16x256xi1>, vector<16x256xi32>
    %cst_9 = arith.constant dense<2147483647> : vector<256xi32>
    %16 = vector.multi_reduction <minsi>, %15, %cst_9 [0] : vector<16x256xi32> to vector<256xi32>
    %17 = vector.shape_cast %16 : vector<256xi32> to vector<1x256xi32>
    %c1_i32 = arith.constant 1 : i32
    %18 = arith.muli %arg0, %c1_i32 : i32
    %19 = arith.addi %18, %arg1 : i32
    %c256_i32 = arith.constant 256 : i32
    %20 = arith.muli %19, %c256_i32 : i32
    %c0_10 = arith.constant 0 : index
    %c0_11 = arith.constant 0 : index
    %21 = vector.load %arg8[%c0_10, %c0_11] : memref<1x256xi32, #tpu.memory_space<vmem>>, vector<1x256xi32>
    %c256_i32_12 = arith.constant 256 : i32
    %22 = arith.subi %c256_i32_12, %20 : i32
    %23 = vector.broadcast %22 : i32 to vector<1x256xi32>
    %24 = arith.cmpi slt, %21, %23 : vector<1x256xi32>
    %25 = vector.broadcast %17 : vector<1x256xi32> to vector<16x256xi32>
    %26 = arith.cmpi eq, %9, %25 : vector<16x256xi32>
    %27 = vector.broadcast %24 : vector<1x256xi1> to vector<16x256xi1>
    %28 = arith.andi %26, %27 : vector<16x256xi1>
    %cst_13 = arith.constant 1.000000e+00 : f32
    %cst_14 = arith.constant 0.000000e+00 : f32
    %29 = vector.broadcast %cst_13 : f32 to vector<16x256xf32>
    %30 = vector.broadcast %cst_14 : f32 to vector<16x256xf32>
    %31 = arith.select %28, %29, %30 : vector<16x256xi1>, vector<16x256xf32>
    %c0_15 = arith.constant 0 : index
    %c0_16 = arith.constant 0 : index
    %32 = vector.load %arg6[%c0_15, %c0_16] : memref<16x1xf32, #tpu.memory_space<vmem>>, vector<16x1xf32>
    %cst_17 = arith.constant dense<0.000000e+00> : vector<16xf32>
    %33 = vector.multi_reduction <add>, %31, %cst_17 [1] : vector<16x256xf32> to vector<16xf32>
    %34 = vector.shape_cast %33 : vector<16xf32> to vector<16x1xf32>
    %35 = arith.addf %32, %34 : vector<16x1xf32>
    %c0_18 = arith.constant 0 : index
    %c0_19 = arith.constant 0 : index
    %36 = vector.load %arg6[%c0_18, %c0_19] : memref<16x1xf32, #tpu.memory_space<vmem>>, vector<16x1xf32>
    tpu.vector_store %arg6[%c0_18, %c0_19], %35 {strides = array<i32>} : memref<16x1xf32, #tpu.memory_space<vmem>>, vector<16x1xf32>,
    %c0_i32_20 = arith.constant 0 : i32
    %37 = arith.cmpi eq, %arg1, %c0_i32_20 : i32
    %38 = arith.extui %37 : i1 to i32
    %c0_i32_21 = arith.constant 0 : i32
    %39 = arith.cmpi ne, %38, %c0_i32_21 : i32
    scf.if %39 {
      %c0_22 = arith.constant 0 : index
      %c0_23 = arith.constant 0 : index
      %40 = vector.load %arg6[%c0_22, %c0_23] : memref<16x1xf32, #tpu.memory_space<vmem>>, vector<16x1xf32>
      %41 = vector.shape_cast %40 : vector<16x1xf32> to vector<1x16x1xf32>
      %c0_24 = arith.constant 0 : index
      %c0_25 = arith.constant 0 : index
      %c0_26 = arith.constant 0 : index
      %42 = vector.load %arg4[%c0_24, %c0_25, %c0_26] : memref<1x16x1xf32, #tpu.memory_space<vmem>>, vector<1x16x1xf32>
      tpu.vector_store %arg4[%c0_24, %c0_25, %c0_26], %41 {strides = array<i32>} : memref<1x16x1xf32, #tpu.memory_space<vmem>>, vector<1x16x1xf32>,
    } else {
    }
    return
  }
  func.func @transform_0(%arg0: i32, %arg1: i32) -> (i32, i32) {
    %c0_i32 = arith.constant 0 : i32
    %c0_i32_0 = arith.constant 0 : i32
    %c0_i32_1 = arith.constant 0 : i32
    return %c0_i32, %c0_i32_0 : i32, i32
  }
  func.func @transform_1(%arg0: i32, %arg1: i32) -> (i32, i32) {
    %c1_i32 = arith.constant 1 : i32
    %0 = arith.muli %arg0, %c1_i32 : i32
    %1 = arith.addi %0, %arg1 : i32
    %c0_i32 = arith.constant 0 : i32
    %2 = arith.minsi %1, %c0_i32 : i32
    %c0_i32_0 = arith.constant 0 : i32
    %c0_i32_1 = arith.constant 0 : i32
    return %2, %c0_i32_0 : i32, i32
  }
  func.func @transform_2(%arg0: i32, %arg1: i32) -> (i32, i32, i32) {
    %c0_i32 = arith.constant 0 : i32
    %c0_i32_0 = arith.constant 0 : i32
    %c0_i32_1 = arith.constant 0 : i32
    return %arg0, %c0_i32, %c0_i32_0 : i32, i32, i32
  }
}

</mosaic_0001>

<bundles_post_ra>
// kernel: tpu_custom_call.1
= control target key start
LH: loop header
LB: loop body
LE: loop exit
PB: predicated region body
PF: predicated region fallthrough
CT: control target
= control target key end

     0   :  { %vm51_vm0 = vcmask 523264   ;;  %v65_v32 = vlaneseq  ;;  %v571_v34 = vmov 0   ;;  %v572_v35 = vmov 1966171168   ;;  %s812_s0 = inlined_call_operand.vmem [shape: f32[16,64], index: 0, kind: input, shape index: {}]   ;;  %s813_s1 = inlined_call_operand.vmem [shape: f32[256,64], index: 1, kind: input, shape index: {}]   ;;  %s814_s2 = inlined_call_operand.vmem [shape: f32[1,16,1], index: 2, kind: output, shape index: {}]  }
   0x1   :  { %v592_v0 = vld [vmem:[%s812_s0] sm:$0xff]  ;;  %vm596_vm1 = vmpackc.low %vm51_vm0, %vm51_vm0  ;;  %v114_v4 = vld [vmem:[%s813_s1 + $0x88] sm:$0xff]  ;;  %569 = vset.pattern.permute.xlu1 %v571_v34  ;;  %v77_v36 = vunpack.c.l.s4 %v572_v35  ;;  %570 = vset.pattern.permute.xlu0 %v571_v34  ;;  %vm60_vm3 = vcmask 7168   ;;  %v573_v1 = vmov 0.0  }
   0x2   :  { %v113_v2 = vld [vmem:[%s813_s1 + $0x80] sm:$0xff]  ;;  %v49_v3 = vmul.f32 %v592_v0, %v592_v0  ;;  %v98_v6 = vld [vmem:[%s813_s1 + $0x8] sm:$0xff]  ;;  %498 = vmatprep.mubr.msk.f32.mxu0 %vm51_vm0, %v592_v0  ;;  %v115_v10 = vld [vmem:[%s813_s1 + $0x90] sm:$0xff]  ;;  %v699_v38 = vshrl.u32 %v65_v32, 7  ;;  %v73_v39 = vand.u32 127, %v65_v32  ;;  %vm92_vm2 = vcmp.lt.s32.totalorder %v65_v32, 256 }
   0x3   :  { %v97_v5 = vld [vmem:[%s813_s1] sm:$0xff]  ;;  %v502_v7 = vpack.c.bf16 %v114_v4, %v113_v2  ;;  %v619_v9 = vld [vmem:[%s812_s0 + $0x8] sm:$0xff]  ;;  %v116_v11 = vld [vmem:[%s813_s1 + $0x98] sm:$0xff]  ;;  %v78_v40 = vunpack.c.0.s8 %v77_v36  ;;  %63 = vst.msk [vmem:[#allocation3] sm:$0xff] %vm60_vm3, %v573_v1 }
   0x4   :  { %v505_v8 = vpack.c.bf16 %v98_v6, %v97_v5  ;;  %v52_v12 = vsel %vm51_vm0, %v49_v3, 0.0  ;;  %v50_v13 = vmul.f32 %v619_v9, %v619_v9  ;;  %v508_v14 = vpack.c.bf16 %v116_v11, %v115_v10  ;;  %500 = vmatprep.mubr.msk.f32.mxu1 %vm51_vm0, %v619_v9  ;;  %v99_v16 = vld [vmem:[%s813_s1 + $0x10] sm:$0xff]  ;;  %v100_v17 = vld [vmem:[%s813_s1 + $0x18] sm:$0xff]  ;;  %v117_v18 = vld [vmem:[%s813_s1 + $0xa0] sm:$0xff]  ;;  %64 = vst.msk [vmem:[#allocation3 + $0x8] sm:$0xff] %vm60_vm3, %v573_v1 }
   0x5   :  { %53 = vadd.xlane.f32.xlu0 %v52_v12  ;;  %504 = vmatprep.subr.msk.bf16.mxu0 %vm596_vm1, %v502_v7  ;;  %v118_v19 = vld [vmem:[%s813_s1 + $0xa8] sm:$0xff]  ;;  %v511_v20 = vpack.c.bf16 %v100_v17, %v99_v16  ;;  %v101_v22 = vld [vmem:[%s813_s1 + $0x20] sm:$0xff]  ;;  %v119_v24 = vld [vmem:[%s813_s1 + $0xb0] sm:$0xff]  ;;  %v74_v41 = vadd.s32 128, %v73_v39  ;;  %v81_v42 = vsub.s32 %v78_v40, %v699_v38  ;;  %v67_v32 = vadd.s32 8, %v699_v38 }
   0x6   :  { %507 = vmatpush3.bf16.xpose.msk.msra.mxu0 %vm596_vm1, %v505_v8  ;;  %v55_v15 = vsel %vm51_vm0, %v50_v13, 0.0  ;;  %550 = vmatprep.subr.msk.bf16.mxu1 %vm596_vm1, %v502_v7  ;;  %v514_v21 = vpack.c.bf16 %v118_v19, %v117_v18  ;;  %v102_v23 = vld [vmem:[%s813_s1 + $0x28] sm:$0xff]  ;;  %v120_v25 = vld [vmem:[%s813_s1 + $0xb8] sm:$0xff]  ;;  %v103_v28 = vld [vmem:[%s813_s1 + $0x30] sm:$0xff] }
   0x7   :  { %558 = vmatpush3.bf16.xpose.msk.msra.mxu1 %vm596_vm1, %v505_v8  ;;  %510 = vmatprep.subr.msk.bf16.mxu0 %vm596_vm1, %v508_v14  ;;  %v517_v26 = vpack.c.bf16 %v102_v23, %v101_v22  ;;  %v520_v27 = vpack.c.bf16 %v120_v25, %v119_v24  ;;  %v104_v29 = vld [vmem:[%s813_s1 + $0x38] sm:$0xff]  ;;  %v121_v30 = vld [vmem:[%s813_s1 + $0xc0] sm:$0xff]  ;;  %v122_v31 = vld [vmem:[%s813_s1 + $0xc8] sm:$0xff]  ;;  %v75_v45 = vcombine.low %v73_v39, %v74_v41 }
   0x8   :  { %551 = vmatprep.subr.msk.bf16.mxu1 %vm596_vm1, %v508_v14  ;;  %v523_v33 = vpack.c.bf16 %v104_v29, %v103_v28  ;;  %v526_v37 = vpack.c.bf16 %v122_v31, %v121_v30  ;;  %v105_v43 = vld [vmem:[%s813_s1 + $0x40] sm:$0xff]  ;;  %v106_v44 = vld [vmem:[%s813_s1 + $0x48] sm:$0xff]  ;;  %v123_v46 = vld [vmem:[%s813_s1 + $0xd0] sm:$0xff] }
   0x9   :  { %56 = vadd.xlane.f32.xlu0 %v55_v15  ;;  %v124_v47 = vld [vmem:[%s813_s1 + $0xd8] sm:$0xff]  ;;  %v82_v48 = vrot.slane %v75_v45, %v81_v42  ;;  %v529_v49 = vpack.c.bf16 %v106_v44, %v105_v43  ;;  %v107_v52 = vld [vmem:[%s813_s1 + $0x50] sm:$0xff]  ;;  %v125_v54 = vld [vmem:[%s813_s1 + $0xe0] sm:$0xff] }
   0xa   :  { %v532_v50 = vpack.c.bf16 %v124_v47, %v123_v46  ;;  %v108_v53 = vld [vmem:[%s813_s1 + $0x58] sm:$0xff]  ;;  %v126_v55 = vld [vmem:[%s813_s1 + $0xe8] sm:$0xff]  ;;  %v109_v58 = vld [vmem:[%s813_s1 + $0x60] sm:$0xff]  ;;  %v386_v46 = vsub.s32 0, %v699_v38 }
   0xb   :  { %v89_v51 = vrot.slane %v82_v48, %v81_v42  ;;  %v535_v56 = vpack.c.bf16 %v108_v53, %v107_v52  ;;  %v538_v57 = vpack.c.bf16 %v126_v55, %v125_v54  ;;  %v110_v59 = vld [vmem:[%s813_s1 + $0x68] sm:$0xff]  ;;  %v127_v60 = vld [vmem:[%s813_s1 + $0xf0] sm:$0xff]  ;;  %v128_v61 = vld [vmem:[%s813_s1 + $0xf8] sm:$0xff] }
   0xc   :  { %v541_v62 = vpack.c.bf16 %v110_v59, %v109_v58  ;;  %v544_v63 = vpack.c.bf16 %v128_v61, %v127_v60  ;;  %v111_v2 = vld [vmem:[%s813_s1 + $0x70] sm:$0xff]  ;;  %v112_v3 = vld [vmem:[%s813_s1 + $0x78] sm:$0xff] }
   0xd   :  { %94 = vst.msk [vmem:[#allocation5] sm:$0x3] %vm92_vm2, %v89_v51  ;;  %v547_v4 = vpack.c.bf16 %v112_v3, %v111_v2 }
   0xe   :  { %513 = vmatpush3.bf16.xpose.msk.msra.mxu0 %vm596_vm1, %v511_v20 }
   0xf   :  { %559 = vmatpush3.bf16.xpose.msk.msra.mxu1 %vm596_vm1, %v511_v20  ;;  %516 = vmatprep.subr.msk.bf16.mxu0 %vm596_vm1, %v514_v21 }
  0x10   :  { %552 = vmatprep.subr.msk.bf16.mxu1 %vm596_vm1, %v514_v21 }
  0x14   :  { %v375_v36 = vld [vmem:[#allocation5] sm:$0x3] }
  0x15   :  { %vm378_vm10 = vcmp.lt.s32.totalorder %v375_v36, 256 }
  0x16   :  { %519 = vmatpush3.bf16.xpose.msk.msra.mxu0 %vm596_vm1, %v517_v26  ;;  %v383_v47 = vsel %vm378_vm10, 1, %v571_v34 }
  0x17   :  { %560 = vmatpush3.bf16.xpose.msk.msra.mxu1 %vm596_vm1, %v517_v26  ;;  %522 = vmatprep.subr.msk.bf16.mxu0 %vm596_vm1, %v520_v27  ;;  %v387_v53 = vrot.slane %v383_v47, %v386_v46 }
  0x18   :  { %553 = vmatprep.subr.msk.bf16.mxu1 %vm596_vm1, %v520_v27 }
  0x1e   :  { %525 = vmatpush3.bf16.xpose.msk.msra.mxu0 %vm596_vm1, %v523_v33 }
  0x1f   :  { %561 = vmatpush3.bf16.xpose.msk.msra.mxu1 %vm596_vm1, %v523_v33  ;;  %528 = vmatprep.subr.msk.bf16.mxu0 %vm596_vm1, %v526_v37 }
  0x20   :  { %554 = vmatprep.subr.msk.bf16.mxu1 %vm596_vm1, %v526_v37 }
  0x26   :  { %531 = vmatpush3.bf16.xpose.msk.msra.mxu0 %vm596_vm1, %v529_v49 }
  0x27   :  { %562 = vmatpush3.bf16.xpose.msk.msra.mxu1 %vm596_vm1, %v529_v49  ;;  %534 = vmatprep.subr.msk.bf16.mxu0 %vm596_vm1, %v532_v50 }
  0x28   :  { %555 = vmatprep.subr.msk.bf16.mxu1 %vm596_vm1, %v532_v50  ;;  %v390_v50 = vsub.s32 1, %v699_v38 }
  0x2e   :  { %537 = vmatpush3.bf16.xpose.msk.msra.mxu0 %vm596_vm1, %v535_v56 }
  0x2f   :  { %563 = vmatpush3.bf16.xpose.msk.msra.mxu1 %vm596_vm1, %v535_v56  ;;  %540 = vmatprep.subr.msk.bf16.mxu0 %vm596_vm1, %v538_v57  ;;  %v391_v56 = vrot.slane %v383_v47, %v390_v50 }
  0x30   :  { %556 = vmatprep.subr.msk.bf16.mxu1 %vm596_vm1, %v538_v57 }
  0x31   :  { %vm393_vm2 = vcmp.eq.s32.totalorder %v391_v56, 1 }
  0x36   :  { %543 = vmatpush3.bf16.xpose.msk.msra.mxu0 %vm596_vm1, %v541_v62 }
  0x37   :  { %564 = vmatpush3.bf16.xpose.msk.msra.mxu1 %vm596_vm1, %v541_v62  ;;  %546 = vmatprep.subr.msk.bf16.mxu0 %vm596_vm1, %v544_v63 }
  0x38   :  { %557 = vmatprep.subr.msk.bf16.mxu1 %vm596_vm1, %v544_v63 }
  0x3e   :  { %549 = vmatpush3.bf16.xpose.msk.msra.mxu0 %vm596_vm1, %v547_v4 }
  0x3f   :  { %565 = vmatpush3.bf16.xpose.msk.msra.mxu1 %vm596_vm1, %v547_v4  ;;  %vm392_vm1 = vcmp.eq.s32.totalorder %v387_v53, 1  ;;  %v403_v4 = vld [vmem:[#allocation3 + $0x8] sm:$0xff] }
  0x45   :  { %499 = vmatmul.mubr.msk.f32.vlgmr.msra.gmra.mrb[0].mxu0 %vm51_vm0, %v592_v0 }
  0x46   :  { %501 = vmatmul.mubr.msk.f32.vlgmr.msra.gmra.mrb[0].mxu1 %vm51_vm0, %v619_v9 }
  0x92   :  { %v54_v5 = vpop.xlane.xlu0 %53 }
  0x93   :  { %v58_v6 = vmul.f32 0.5, %v54_v5 }
  0x95   :  { %61 = vst.msk [vmem:[#allocation2] sm:$0xff] %vm60_vm3, %v58_v6  ;;  %v402_v6 = vld [vmem:[#allocation3] sm:$0xff] }
  0x96   :  { %v57_v7 = vpop.xlane.xlu0 %56 }
  0x97   :  { %v59_v8 = vmul.f32 0.5, %v57_v7 }
  0x99   :  { %62 = vst.msk [vmem:[#allocation2 + $0x8] sm:$0xff] %vm60_vm3, %v59_v8 }
  0x9c   :  { %v309_v10 = vld [vmem:[#allocation2] sm:$0xff] }
  0x9d   :  { %313 = vperm.xlu1 %569, %v309_v10  }
  0xa0   :  { %v310_v11 = vld [vmem:[#allocation2 + $0x8] sm:$0xff] }
  0xa1   :  { %318 = vperm.xlu1 %569, %v310_v11  }
 0x118   :  { %v298_v0 = vpop.f32.mrb[0].mxu0 }
 0x119   :  { %v300_v9 = vpop.f32.mrb[1].mxu0  ;;  %v304_v12 = vpop.f32.mrb[0].mxu1 }
 0x11a   :  { %v306_v13 = vpop.f32.mrb[1].mxu1 }
 0x11c   :  { %v314_v14 = vpop.permute.xlu1 %313 }
 0x11d   :  { %v321_v16 = vsub.f32 %v298_v0, %v314_v14  ;;  %v322_v17 = vsub.f32 %v300_v9, %v314_v14 }
 0x120   :  { %v319_v15 = vpop.permute.xlu1 %318 }
 0x121   :  { %v323_v18 = vsub.f32 %v304_v12, %v319_v15  ;;  %v324_v19 = vsub.f32 %v306_v13, %v319_v15 }
 0x123   :  { %v329_v20 = vmax.f32 %v321_v16, %v323_v18  ;;  %v336_v21 = vmax.f32 %v322_v17, %v324_v19 }
 0x125   :  { %v330_v22 = vrot.slane %v329_v20, 4  ;;  %v337_v23 = vrot.slane %v336_v21, 4 }
 0x127   :  { %v331_v24 = vmax.f32 %v329_v20, %v330_v22  ;;  %v338_v25 = vmax.f32 %v336_v21, %v337_v23 }
 0x129   :  { %v332_v26 = vrot.slane %v331_v24, 2  ;;  %v339_v27 = vrot.slane %v338_v25, 2 }
 0x12b   :  { %v333_v28 = vmax.f32 %v331_v24, %v332_v26  ;;  %v340_v29 = vmax.f32 %v338_v25, %v339_v27 }
 0x12d   :  { %v334_v30 = vrot.slane %v333_v28, 1  ;;  %v341_v31 = vrot.slane %v340_v29, 1 }
 0x12f   :  { %v335_v33 = vmax.f32 %v333_v28, %v334_v30  ;;  %v342_v35 = vmax.f32 %v340_v29, %v341_v31 }
 0x131   :  { %vm343_vm4 = vcmp.ge.f32.partialorder %v321_v16, %v335_v33  ;;  %vm344_vm5 = vcmp.ge.f32.partialorder %v322_v17, %v342_v35  ;;  %vm345_vm6 = vcmp.ge.f32.partialorder %v323_v18, %v335_v33  ;;  %vm346_vm7 = vcmp.ge.f32.partialorder %v324_v19, %v342_v35 }
 0x132   :  { %v347_v37 = vsel %vm343_vm4, %v699_v38, 16  ;;  %v348_v39 = vsel %vm344_vm5, %v699_v38, 16  ;;  %v349_v40 = vsel %vm345_vm6, %v67_v32, 16  ;;  %v350_v41 = vsel %vm346_vm7, %v67_v32, 16 }
 0x133   :  { %vm351_vm8 = vcmp.lt.s32.totalorder %v347_v37, %v349_v40  ;;  %vm362_vm9 = vcmp.lt.s32.totalorder %v348_v39, %v350_v41 }
 0x134   :  { %v352_v42 = vsel %vm351_vm8, %v347_v37, %v349_v40  ;;  %v363_v43 = vsel %vm362_vm9, %v348_v39, %v350_v41 }
 0x135   :  { %v353_v44 = vrot.slane %v352_v42, 4  ;;  %v364_v45 = vrot.slane %v363_v43, 4 }
 0x137   :  { %vm354_vm11 = vcmp.lt.s32.totalorder %v352_v42, %v353_v44  ;;  %vm365_vm12 = vcmp.lt.s32.totalorder %v363_v43, %v364_v45 }
 0x138   :  { %v355_v48 = vsel %vm354_vm11, %v352_v42, %v353_v44  ;;  %v366_v49 = vsel %vm365_vm12, %v363_v43, %v364_v45 }
 0x139   :  { %v356_v51 = vrot.slane %v355_v48, 2  ;;  %v367_v52 = vrot.slane %v366_v49, 2 }
 0x13b   :  { %vm357_vm13 = vcmp.lt.s32.totalorder %v355_v48, %v356_v51  ;;  %vm368_vm14 = vcmp.lt.s32.totalorder %v366_v49, %v367_v52 }
 0x13c   :  { %v358_v54 = vsel %vm357_vm13, %v355_v48, %v356_v51  ;;  %v369_v55 = vsel %vm368_vm14, %v366_v49, %v367_v52 }
 0x13d   :  { %v359_v57 = vrot.slane %v358_v54, 1  ;;  %v370_v58 = vrot.slane %v369_v55, 1 }
 0x13f   :  { %vm360_vm15 = vcmp.lt.s32.totalorder %v358_v54, %v359_v57  ;;  %vm371_vm0 = vcmp.lt.s32.totalorder %v369_v55, %v370_v58 }
 0x140   :  { %v361_v59 = vsel %vm360_vm15, %v358_v54, %v359_v57  ;;  %v372_v60 = vsel %vm371_vm0, %v369_v55, %v370_v58 }
 0x141   :  { %vm381_vm4 = vcmp.eq.s32.totalorder %v67_v32, %v361_v59  ;;  %vm382_vm5 = vcmp.eq.s32.totalorder %v67_v32, %v372_v60  ;;  %vm379_vm6 = vcmp.eq.s32.totalorder %v699_v38, %v361_v59  ;;  %vm380_vm8 = vcmp.eq.s32.totalorder %v699_v38, %v372_v60 }
 0x142   :  { %vm396_vm7 = vmand %vm381_vm4, %vm392_vm1 }
 0x143   :  { %vm397_vm9 = vmand %vm382_vm5, %vm393_vm2  ;;  %v400_v34 = vsel %vm396_vm7, 1.0, %v573_v1 }
 0x144   :  { %v401_v61 = vsel %vm397_vm9, 1.0, %v573_v1  ;;  %vm394_vm10 = vmand %vm379_vm6, %vm392_vm1 }
 0x145   :  { %v407_v62 = vadd.f32 %v401_v61, %v400_v34  ;;  %vm395_vm11 = vmand %vm380_vm8, %vm393_vm2  ;;  %v398_v63 = vsel %vm394_vm10, 1.0, %v573_v1 }
 0x146   :  { %v399_v2 = vsel %vm395_vm11, 1.0, %v573_v1 }
 0x147   :  { %408 = vadd.xlane.f32.xlu1 %v407_v62  ;;  %v404_v3 = vadd.f32 %v399_v2, %v398_v63 }
 0x149   :  { %405 = vadd.xlane.f32.xlu0 %v404_v3 }
 0x1d4   :  { %v409_v5 = vpop.xlane.xlu1 %408 }
 0x1d5   :  { %v411_v7 = vadd.f32 %v409_v5, %v403_v4 }
 0x1d6   :  { %v406_v38 = vpop.xlane.xlu0 %405 }
 0x1d7   :  { %414 = vst.msk [vmem:[#allocation3 + $0x8] sm:$0xff] %vm60_vm3, %v411_v7  ;;  %v410_v8 = vadd.f32 %v406_v38, %v402_v6 }
 0x1d9   :  { %413 = vst.msk [vmem:[#allocation3] sm:$0xff] %vm60_vm3, %v410_v8 }
 0x1de   :  { %v419_v10 = vld [vmem:[#allocation3 + $0x8] sm:$0xff] }
 0x1df   :  { %421 = vst.msk [vmem:[%s814_s2 + $0x8] sm:$0xff] %vm60_vm3, %v419_v10 }
 0x1e0   :  { %v418_v11 = vld [vmem:[#allocation3] sm:$0xff] }
 0x1e1   :  { %420 = vst.msk [vmem:[%s814_s2] sm:$0xff] %vm60_vm3, %v418_v11 }

</bundles_post_ra>
